<compile_context>
chip_gen: v6e
topology: v6e:2x2x1
jax: 0.10.0
libtpu: 0.0.40
codegen_flags: <defaults>
</compile_context>

<pallas_src>
import math

import jax
import jax.numpy as jnp
from jax.experimental import pallas as pl
from jax.experimental.pallas import tpu as pltpu


_LANES = 1024  # lane-dense row width (8 * 128); multiple of 128


def _bag_kernel(a_ref, b_ref, g_ref, o_ref):
    # sig = sigmoid(input3); out = input1 * sig + input2 * (1 - sig)
    g = g_ref[...].astype(jnp.float32)
    sig = jax.nn.sigmoid(g)                       # exp -> EUP slot
    a = a_ref[...].astype(jnp.float32)
    b = b_ref[...].astype(jnp.float32)
    out = a * sig + b * (1.0 - sig)
    o_ref[...] = out.astype(o_ref.dtype)


def bag_forward(input1, input2, input3, *, max_block_rows=256):
    """Elementwise sigmoid gate: input1 * sig(input3) + input2 * (1 - sig)."""
    assert input1.shape == input2.shape == input3.shape
    shape = input1.shape
    dtype = jnp.result_type(input1.dtype, input2.dtype, input3.dtype)

    total = math.prod(shape)
    rows_needed = pl.cdiv(total, _LANES)
    # Clamp the row tile so small inputs are a single (padding-free) block;
    # large inputs stream in ~1 MiB/operand tiles.
    block_rows = min(max_block_rows, max(8, ((rows_needed + 7) // 8) * 8))
    rows = pl.cdiv(rows_needed, block_rows) * block_rows
    padded = rows * _LANES

    def prep(x):
        x = x.astype(dtype).reshape(-1)
        if padded != total:
            x = jnp.pad(x, (0, padded - total))
        return x.reshape(rows, _LANES)

    a = prep(input1)
    b = prep(input2)
    g = prep(input3)

    spec = pl.BlockSpec((block_rows, _LANES), lambda i: (i, 0))
    out = pl.pallas_call(
        _bag_kernel,
        out_shape=jax.ShapeDtypeStruct((rows, _LANES), dtype),
        grid_spec=pltpu.PrefetchScalarGridSpec(
            num_scalar_prefetch=0,
            grid=(rows // block_rows,),
            in_specs=[spec, spec, spec],
            out_specs=spec,
        ),
        compiler_params=pltpu.CompilerParams(
            dimension_semantics=("parallel",)),
    )(a, b, g)

    return out.reshape(-1)[:total].reshape(shape)


if __name__ == "__main__":
    key = jax.random.PRNGKey(0)
    k1, k2, k3 = jax.random.split(key, 3)

    # Shapes consistent with the module (64 channels implied by conv1/norm).
    N, C, H, W = 2, 64, 16, 16
    input1 = jax.random.normal(k1, (N, C, H, W), jnp.float32)
    input2 = jax.random.normal(k2, (N, C, H, W), jnp.float32)
    input3 = jax.random.normal(k3, (N, C, H, W), jnp.float32)

    out = bag_forward(input1, input2, input3)
    jax.block_until_ready(out)

    # Correctness check vs. pure-JAX reference of the PyTorch forward.
    sig = jax.nn.sigmoid(input3)
    ref = input1 * sig + input2 * (1.0 - sig)
    assert out.shape == ref.shape
    assert jnp.max(jnp.abs(out - ref)) < 1e-5

    print("KERNEL_OK")
</pallas_src>

<mosaic_0001>
module attributes {stable_mosaic.version = 11 : i64} {
  func.func @_bag_kernel(%arg0: i32, %arg1: memref<32x1024xf32, #tpu.memory_space<vmem>>, %arg2: memref<32x1024xf32, #tpu.memory_space<vmem>>, %arg3: memref<32x1024xf32, #tpu.memory_space<vmem>>, %arg4: memref<32x1024xf32, #tpu.memory_space<vmem>>) attributes {dimension_semantics = [#tpu.dimension_semantics<parallel>], iteration_bounds = array<i64: 1>, scalar_prefetch = 0 : i64, scratch_operands = 0 : i64, tpu.core_type = #tpu.core_type<tc>, window_params = [{transform_indices = @transform_0, window_bounds = array<i64: 32, 1024>}, {transform_indices = @transform_1, window_bounds = array<i64: 32, 1024>}, {transform_indices = @transform_2, window_bounds = array<i64: 32, 1024>}, {transform_indices = @transform_3, window_bounds = array<i64: 32, 1024>}]} {
    %c0 = arith.constant 0 : index
    %c0_0 = arith.constant 0 : index
    %0 = vector.load %arg3[%c0, %c0_0] : memref<32x1024xf32, #tpu.memory_space<vmem>>, vector<32x1024xf32>
    %1 = arith.negf %0 : vector<32x1024xf32>
    %2 = math.exp %1 : vector<32x1024xf32>
    %cst = arith.constant 1.000000e+00 : f32
    %3 = vector.broadcast %cst : f32 to vector<32x1024xf32>
    %4 = arith.addf %3, %2 : vector<32x1024xf32>
    %5 = arith.divf %3, %4 : vector<32x1024xf32>
    %c0_1 = arith.constant 0 : index
    %c0_2 = arith.constant 0 : index
    %6 = vector.load %arg1[%c0_1, %c0_2] : memref<32x1024xf32, #tpu.memory_space<vmem>>, vector<32x1024xf32>
    %c0_3 = arith.constant 0 : index
    %c0_4 = arith.constant 0 : index
    %7 = vector.load %arg2[%c0_3, %c0_4] : memref<32x1024xf32, #tpu.memory_space<vmem>>, vector<32x1024xf32>
    %8 = arith.mulf %6, %5 : vector<32x1024xf32>
    %cst_5 = arith.constant 1.000000e+00 : f32
    %9 = vector.broadcast %cst_5 : f32 to vector<32x1024xf32>
    %10 = arith.subf %9, %5 : vector<32x1024xf32>
    %11 = arith.mulf %7, %10 : vector<32x1024xf32>
    %12 = arith.addf %8, %11 : vector<32x1024xf32>
    %c0_6 = arith.constant 0 : index
    %c0_7 = arith.constant 0 : index
    %13 = vector.load %arg4[%c0_6, %c0_7] : memref<32x1024xf32, #tpu.memory_space<vmem>>, vector<32x1024xf32>
    tpu.vector_store %arg4[%c0_6, %c0_7], %12 {strides = array<i32>} : memref<32x1024xf32, #tpu.memory_space<vmem>>, vector<32x1024xf32>,
    return
  }
  func.func @transform_0(%arg0: i32) -> (i32, i32) {
    %c0_i32 = arith.constant 0 : i32
    %c0_i32_0 = arith.constant 0 : i32
    return %arg0, %c0_i32 : i32, i32
  }
  func.func @transform_1(%arg0: i32) -> (i32, i32) {
    %c0_i32 = arith.constant 0 : i32
    %c0_i32_0 = arith.constant 0 : i32
    return %arg0, %c0_i32 : i32, i32
  }
  func.func @transform_2(%arg0: i32) -> (i32, i32) {
    %c0_i32 = arith.constant 0 : i32
    %c0_i32_0 = arith.constant 0 : i32
    return %arg0, %c0_i32 : i32, i32
  }
  func.func @transform_3(%arg0: i32) -> (i32, i32) {
    %c0_i32 = arith.constant 0 : i32
    %c0_i32_0 = arith.constant 0 : i32
    return %arg0, %c0_i32 : i32, i32
  }
}

</mosaic_0001>

<bundles_post_ra>
// kernel: tpu_custom_call.1
= control target key start
LH: loop header
LB: loop body
LE: loop exit
PB: predicated region body
PF: predicated region fallthrough
CT: control target
= control target key end

     0   :  { %8 = vsyncpa [#allocation3], 0  ;;  %s836_s0 = inlined_call_operand.hbm [shape: f32[32,1024], index: 0, kind: input, shape index: {}]   ;;  %s837_s1 = inlined_call_operand.hbm [shape: f32[32,1024], index: 1, kind: input, shape index: {}]   ;;  %s838_s2 = inlined_call_operand.hbm [shape: f32[32,1024], index: 2, kind: input, shape index: {}]   ;;  %s839_s3 = inlined_call_operand.hbm [shape: f32[32,1024], index: 3, kind: output, shape index: {}]  }
   0x1   :  { %9 = vsyncpa [#allocation6], 0 }
   0x2   :  { %10 = vsyncpa [#allocation4], 0  ;;  %s774_s12 = smov [#allocation5]   ;;  %s775_s14 = smov [#allocation2]  }
   0x3   :  { %s28_s13 = sshll.u32 %s774_s12, 4  ;;  %s16_s15 = sshll.u32 %s775_s14, 4  ;;  %s29_s13 = int_to_ptr.vmem [resolvable:$true] %s28_s13  ;;  %s17_s15 = int_to_ptr.vmem [resolvable:$true] %s16_s15 }
   0x4   :  { %s696_s16 = scalar_lea.vmem %s29_s13, 4096  ;;  %p701_p1 = scmp.lt.s32.totalorder %s29_s13, %s29_s13 }
   0x5   :  { %p697_p0 = scmp.ne.s32.totalorder %s29_s13, %s696_s16  ;;  %p702_p2 = scmp.lt.s32.totalorder %s696_s16, %s696_s16 }
   0x7   :  { %p703_p3 = por %p702_p2, %p701_p1 }
   0x9   :  { %p704_p4 = pnand %p703_p3, %p697_p0 }
   0xb   :  { %707 = shalt.err (!%p704_p4)
}
   0xc   :  { %s776_s17 = smov 1024   ;;  %s777_s18 = smov 64  }
   0xd   :  { %34 = dma.hbm_to_vmem [thread:$0]  %s837_s1, 4096, %s29_s13, [#allocation6], %s776_s17, %s776_s17, %s777_s18  }
   0xe   :  { %s716_s21 = scalar_lea.vmem %s17_s15, 4096  ;;  %p721_p6 = scmp.lt.s32.totalorder %s17_s15, %s17_s15 }
   0xf   :  { %p717_p5 = scmp.ne.s32.totalorder %s17_s15, %s716_s21  ;;  %p722_p7 = scmp.lt.s32.totalorder %s716_s21, %s716_s21 }
  0x11   :  { %p723_p8 = por %p722_p7, %p721_p6 }
  0x13   :  { %p724_p9 = pnand %p723_p8, %p717_p5 }
  0x15   :  { %727 = shalt.err (!%p724_p9)
}
  0x16   :  { %22 = dma.hbm_to_vmem [thread:$0]  %s836_s0, 4096, %s17_s15, [#allocation3], %s776_s17, %s776_s17, %s777_s18  }
  0x17   :  { %s778_s24 = smov [#allocation7]  }
  0x18   :  { %s40_s25 = sshll.u32 %s778_s24, 4  ;;  %s41_s25 = int_to_ptr.vmem [resolvable:$true] %s40_s25 }
  0x19   :  { %s736_s26 = scalar_lea.vmem %s41_s25, 4096  ;;  %p741_p11 = scmp.lt.s32.totalorder %s41_s25, %s41_s25 }
  0x1a   :  { %p737_p10 = scmp.ne.s32.totalorder %s41_s25, %s736_s26  ;;  %p742_p12 = scmp.lt.s32.totalorder %s736_s26, %s736_s26 }
  0x1c   :  { %p743_p13 = por %p742_p12, %p741_p11 }
  0x1e   :  { %p744_p0 = pnand %p743_p13, %p737_p10 }
  0x20   :  { %747 = shalt.err (!%p744_p0)
}
  0x21   :  { %46 = dma.hbm_to_vmem [thread:$0]  %s838_s2, 4096, %s41_s25, [#allocation6], %s776_s17, %s776_s17, %s777_s18  }
  0x22   :  { %768 = dma.done.wait [#allocation3], 4096  }
  0x23   :  { %769 = vsyncadd [#allocation3], 4294963200 }
  0x24   :  { %770 = dma.done.wait [#allocation6], 8192  }
  0x25   :  { %771 = vsyncadd [#allocation6], 4294959104  ;;  %v56_v0 = vld [vmem:[#allocation7] sm:$0xff]  ;;  %v57_v2 = vld [vmem:[#allocation7 + $0x8] sm:$0xff]  ;;  %s779_s0 = smov [#allocation8]  }
  0x26   :  { %v522_v1 = vmul.f32 -1.442695, %v56_v0  ;;  %v523_v3 = vmul.f32 -1.442695, %v57_v2  ;;  %v58_v4 = vld [vmem:[#allocation7 + $0x10] sm:$0xff]  ;;  %v59_v6 = vld [vmem:[#allocation7 + $0x18] sm:$0xff] }
  0x27   :  { %v524_v5 = vmul.f32 -1.442695, %v58_v4  ;;  %v525_v7 = vmul.f32 -1.442695, %v59_v6  ;;  %v60_v8 = vld [vmem:[#allocation7 + $0x20] sm:$0xff]  ;;  %v61_v10 = vld [vmem:[#allocation7 + $0x28] sm:$0xff] }
  0x28   :  { %560 = vpow2.f32 %v522_v1  ;;  %v526_v9 = vmul.f32 -1.442695, %v60_v8  ;;  %v527_v11 = vmul.f32 -1.442695, %v61_v10  ;;  %v62_v12 = vld [vmem:[#allocation7 + $0x30] sm:$0xff]  ;;  %v63_v14 = vld [vmem:[#allocation7 + $0x38] sm:$0xff] }
  0x29   :  { %562 = vpow2.f32 %v523_v3  ;;  %v528_v13 = vmul.f32 -1.442695, %v62_v12  ;;  %v529_v15 = vmul.f32 -1.442695, %v63_v14  ;;  %v64_v16 = vld [vmem:[#allocation7 + $0x40] sm:$0xff]  ;;  %v65_v18 = vld [vmem:[#allocation7 + $0x48] sm:$0xff] }
  0x2a   :  { %564 = vpow2.f32 %v524_v5  ;;  %v530_v17 = vmul.f32 -1.442695, %v64_v16  ;;  %v531_v19 = vmul.f32 -1.442695, %v65_v18  ;;  %v66_v20 = vld [vmem:[#allocation7 + $0x50] sm:$0xff]  ;;  %v67_v22 = vld [vmem:[#allocation7 + $0x58] sm:$0xff] }
  0x2b   :  { %566 = vpow2.f32 %v525_v7  ;;  %v532_v21 = vmul.f32 -1.442695, %v66_v20  ;;  %v533_v23 = vmul.f32 -1.442695, %v67_v22  ;;  %v68_v24 = vld [vmem:[#allocation7 + $0x60] sm:$0xff]  ;;  %v69_v26 = vld [vmem:[#allocation7 + $0x68] sm:$0xff] }
  0x2c   :  { %568 = vpow2.f32 %v526_v9  ;;  %v534_v25 = vmul.f32 -1.442695, %v68_v24  ;;  %v535_v27 = vmul.f32 -1.442695, %v69_v26  ;;  %v70_v28 = vld [vmem:[#allocation7 + $0x70] sm:$0xff]  ;;  %v71_v30 = vld [vmem:[#allocation7 + $0x78] sm:$0xff] }
  0x2d   :  { %570 = vpow2.f32 %v527_v11  ;;  %v536_v29 = vmul.f32 -1.442695, %v70_v28  ;;  %v537_v32 = vmul.f32 -1.442695, %v71_v30  ;;  %v72_v57 = vld [vmem:[#allocation7 + $0x80] sm:$0xff]  ;;  %v73_v58 = vld [vmem:[#allocation7 + $0x88] sm:$0xff] }
  0x2e   :  { %572 = vpow2.f32 %v528_v13  ;;  %v280_v60 = vld [vmem:[#allocation2] sm:$0xff]  ;;  %v74_v62 = vld [vmem:[#allocation7 + $0x90] sm:$0xff]  ;;  %v75_v63 = vld [vmem:[#allocation7 + $0x98] sm:$0xff]  ;;  %v538_v7 = vmul.f32 -1.442695, %v72_v57  ;;  %s509_s2 = sshll.u32 %s779_s0, 4  ;;  %s510_s2 = int_to_ptr.vmem [resolvable:$true] %s509_s2 }
  0x2f   :  { %574 = vpow2.f32 %v529_v15  ;;  %v312_v1 = vld [vmem:[#allocation5] sm:$0xff]  ;;  %v281_v2 = vld [vmem:[#allocation2 + $0x8] sm:$0xff]  ;;  %v539_v8 = vmul.f32 -1.442695, %v73_v58  ;;  %v282_v11 = vld [vmem:[#allocation2 + $0x10] sm:$0xff]  ;;  %s748_s28 = scalar_lea.vmem %s510_s2, 4096  ;;  %p753_p2 = scmp.lt.s32.totalorder %s510_s2, %s510_s2 }
  0x30   :  { %576 = vpow2.f32 %v530_v17  ;;  %v76_v4 = vld [vmem:[#allocation7 + $0xa0] sm:$0xff]  ;;  %v77_v9 = vld [vmem:[#allocation7 + $0xa8] sm:$0xff]  ;;  %v818_v13 = vmul.f32 -1.442695, %v74_v62  ;;  %v820_v14 = vmul.f32 -1.442695, %v75_v63  ;;  %p749_p1 = scmp.ne.s32.totalorder %s510_s2, %s748_s28  ;;  %p754_p3 = scmp.lt.s32.totalorder %s748_s28, %s748_s28 }
  0x31   :  { %578 = vpow2.f32 %v531_v19  ;;  %v313_v18 = vld [vmem:[#allocation5 + $0x8] sm:$0xff]  ;;  %v283_v19 = vld [vmem:[#allocation2 + $0x18] sm:$0xff]  ;;  %v822_v20 = vmul.f32 -1.442695, %v76_v4  ;;  %v314_v24 = vld [vmem:[#allocation5 + $0x10] sm:$0xff] }
  0x32   :  { %580 = vpow2.f32 %v532_v21  ;;  %v824_v26 = vmul.f32 -1.442695, %v77_v9  ;;  %v319_v58 = vld [vmem:[#allocation5 + $0x38] sm:$0xff]  ;;  %p755_p4 = por %p754_p3, %p753_p2 }
  0x33   :  { %582 = vpow2.f32 %v533_v23  ;;  %v291_v9 = vld [vmem:[#allocation2 + $0x58] sm:$0xff] }
  0x34   :  { %584 = vpow2.f32 %v534_v25  ;;  %v284_v25 = vld [vmem:[#allocation2 + $0x20] sm:$0xff]  ;;  %p756_p5 = pnand %p755_p4, %p749_p1 }
  0x35   :  { %v561_v31 = vpop.eup %560  ;;  %586 = vpow2.f32 %v535_v27 }
  0x36   :  { %v563_v33 = vpop.eup %562  ;;  %v184_v34 = vadd.f32 1.0, %v561_v31  ;;  %588 = vpow2.f32 %v536_v29  ;;  %v315_v31 = vld [vmem:[#allocation5 + $0x18] sm:$0xff] }
  0x37   :  { %v565_v35 = vpop.eup %564  ;;  %v185_v36 = vadd.f32 1.0, %v563_v33  ;;  %590 = vpow2.f32 %v537_v32  ;;  %v285_v32 = vld [vmem:[#allocation2 + $0x28] sm:$0xff] }
  0x38   :  { %v567_v37 = vpop.eup %566  ;;  %592 = vrcp.f32 %v184_v34  ;;  %v186_v38 = vadd.f32 1.0, %v565_v35 }
  0x39   :  { %v569_v39 = vpop.eup %568  ;;  %594 = vrcp.f32 %v185_v36  ;;  %v187_v40 = vadd.f32 1.0, %v567_v37  ;;  %v316_v37 = vld [vmem:[#allocation5 + $0x20] sm:$0xff] }
  0x3a   :  { %v571_v41 = vpop.eup %570  ;;  %596 = vrcp.f32 %v186_v38  ;;  %v188_v42 = vadd.f32 1.0, %v569_v39  ;;  %v286_v38 = vld [vmem:[#allocation2 + $0x30] sm:$0xff] }
  0x3b   :  { %v573_v43 = vpop.eup %572  ;;  %598 = vrcp.f32 %v187_v40  ;;  %v189_v44 = vadd.f32 1.0, %v571_v41 }
  0x3c   :  { %v575_v45 = vpop.eup %574  ;;  %600 = vrcp.f32 %v188_v42  ;;  %v190_v46 = vadd.f32 1.0, %v573_v43 }
  0x3d   :  { %v577_v47 = vpop.eup %576  ;;  %602 = vrcp.f32 %v189_v44  ;;  %v191_v48 = vadd.f32 1.0, %v575_v45  ;;  %v317_v44 = vld [vmem:[#allocation5 + $0x28] sm:$0xff]  ;;  %v287_v45 = vld [vmem:[#allocation2 + $0x38] sm:$0xff] }
  0x3e   :  { %v579_v49 = vpop.eup %578  ;;  %604 = vrcp.f32 %v190_v46  ;;  %v192_v50 = vadd.f32 1.0, %v577_v47 }
  0x3f   :  { %v581_v51 = vpop.eup %580  ;;  %606 = vrcp.f32 %v191_v48  ;;  %v193_v52 = vadd.f32 1.0, %v579_v49 }
  0x40   :  { %v583_v53 = vpop.eup %582  ;;  %608 = vrcp.f32 %v192_v50  ;;  %v194_v54 = vadd.f32 1.0, %v581_v51  ;;  %v318_v51 = vld [vmem:[#allocation5 + $0x30] sm:$0xff] }
  0x41   :  { %v585_v55 = vpop.eup %584  ;;  %610 = vrcp.f32 %v193_v52  ;;  %v195_v56 = vadd.f32 1.0, %v583_v53  ;;  %v288_v52 = vld [vmem:[#allocation2 + $0x40] sm:$0xff] }
  0x42   :  { %v587_v59 = vpop.eup %586  ;;  %612 = vrcp.f32 %v194_v54  ;;  %v196_v61 = vadd.f32 1.0, %v585_v55 }
  0x43   :  { %v589_v0 = vpop.eup %588  ;;  %614 = vrcp.f32 %v195_v56  ;;  %v197_v3 = vadd.f32 1.0, %v587_v59  ;;  %v289_v59 = vld [vmem:[#allocation2 + $0x48] sm:$0xff] }
  0x44   :  { %v591_v5 = vpop.eup %590  ;;  %616 = vrcp.f32 %v196_v61  ;;  %v198_v6 = vadd.f32 1.0, %v589_v0 }
  0x45   :  { %v593_v10 = vpop.eup %592  ;;  %618 = vrcp.f32 %v197_v3  ;;  %v199_v12 = vadd.f32 1.0, %v591_v5 }
  0x46   :  { %v595_v15 = vpop.eup %594  ;;  %v344_v16 = vmul.f32 %v593_v10, %v280_v60  ;;  %v376_v17 = vsub.f32 1.0, %v593_v10  ;;  %620 = vrcp.f32 %v198_v6 }
  0x47   :  { %v597_v21 = vpop.eup %596  ;;  %v345_v22 = vmul.f32 %v595_v15, %v281_v2  ;;  %v377_v23 = vsub.f32 1.0, %v595_v15  ;;  %622 = vrcp.f32 %v199_v12  ;;  %v290_v2 = vld [vmem:[#allocation2 + $0x50] sm:$0xff] }
  0x48   :  { %v599_v27 = vpop.eup %598  ;;  %v408_v28 = vmul.f32 %v376_v17, %v312_v1  ;;  %v346_v29 = vmul.f32 %v597_v21, %v282_v11  ;;  %v378_v30 = vsub.f32 1.0, %v597_v21  ;;  %624 = vpow2.f32 %v538_v7  ;;  %v320_v1 = vld [vmem:[#allocation5 + $0x40] sm:$0xff]  ;;  %v322_v17 = vld [vmem:[#allocation5 + $0x50] sm:$0xff] }
  0x49   :  { %v601_v33 = vpop.eup %600  ;;  %v409_v34 = vmul.f32 %v377_v23, %v313_v18  ;;  %v347_v35 = vmul.f32 %v599_v27, %v283_v19  ;;  %v379_v36 = vsub.f32 1.0, %v599_v27  ;;  %626 = vpow2.f32 %v539_v8  ;;  %v321_v8 = vld [vmem:[#allocation5 + $0x48] sm:$0xff]  ;;  %v292_v18 = vld [vmem:[#allocation2 + $0x60] sm:$0xff] }
  0x4a   :  { %v603_v39 = vpop.eup %602  ;;  %v440_v40 = vadd.f32 %v408_v28, %v344_v16  ;;  %v410_v41 = vmul.f32 %v378_v30, %v314_v24  ;;  %v348_v42 = vmul.f32 %v601_v33, %v284_v25  ;;  %v380_v43 = vsub.f32 1.0, %v601_v33  ;;  %v323_v25 = vld [vmem:[#allocation5 + $0x58] sm:$0xff]  ;;  %v293_v27 = vld [vmem:[#allocation2 + $0x68] sm:$0xff]  ;;  %v324_v33 = vld [vmem:[#allocation5 + $0x60] sm:$0xff] }
  0x4b   :  { %v605_v46 = vpop.eup %604  ;;  %v441_v47 = vadd.f32 %v409_v34, %v345_v22  ;;  %v411_v48 = vmul.f32 %v379_v36, %v315_v31  ;;  %v349_v49 = vmul.f32 %v603_v39, %v285_v32  ;;  %v381_v50 = vsub.f32 1.0, %v603_v39  ;;  %v294_v34 = vld [vmem:[#allocation2 + $0x70] sm:$0xff] }
  0x4c   :  { %v607_v53 = vpop.eup %606  ;;  %472 = vst [vmem:[#allocation8] sm:$0xff] %v440_v40  ;;  %v442_v54 = vadd.f32 %v410_v41, %v346_v29  ;;  %v412_v55 = vmul.f32 %v380_v43, %v316_v37  ;;  %v350_v56 = vmul.f32 %v605_v46, %v286_v38  ;;  %v382_v57 = vsub.f32 1.0, %v605_v46  ;;  %v325_v40 = vld [vmem:[#allocation5 + $0x68] sm:$0xff]  ;;  %v295_v41 = vld [vmem:[#allocation2 + $0x78] sm:$0xff] }
  0x4d   :  { %v609_v60 = vpop.eup %608  ;;  %473 = vst [vmem:[#allocation8 + $0x8] sm:$0xff] %v441_v47  ;;  %v443_v61 = vadd.f32 %v411_v48, %v347_v35  ;;  %v413_v62 = vmul.f32 %v381_v50, %v317_v44  ;;  %v351_v63 = vmul.f32 %v607_v53, %v287_v45  ;;  %v383_v0 = vsub.f32 1.0, %v607_v53  ;;  %v326_v47 = vld [vmem:[#allocation5 + $0x70] sm:$0xff]  ;;  %v327_v53 = vld [vmem:[#allocation5 + $0x78] sm:$0xff] }
  0x4e   :  { %v611_v3 = vpop.eup %610  ;;  %474 = vst [vmem:[#allocation8 + $0x10] sm:$0xff] %v442_v54  ;;  %v444_v4 = vadd.f32 %v412_v55, %v348_v42  ;;  %v414_v5 = vmul.f32 %v382_v57, %v318_v51  ;;  %v352_v6 = vmul.f32 %v609_v60, %v288_v52  ;;  %v384_v7 = vsub.f32 1.0, %v609_v60 }
  0x4f   :  { %v613_v10 = vpop.eup %612  ;;  %475 = vst [vmem:[#allocation8 + $0x18] sm:$0xff] %v443_v61  ;;  %v445_v11 = vadd.f32 %v413_v62, %v349_v49  ;;  %v415_v12 = vmul.f32 %v383_v0, %v319_v58  ;;  %v353_v15 = vmul.f32 %v611_v3, %v289_v59  ;;  %v385_v16 = vsub.f32 1.0, %v611_v3  ;;  %v78_v59 = vld [vmem:[#allocation7 + $0xb0] sm:$0xff]  ;;  %v79_v0 = vld [vmem:[#allocation7 + $0xb8] sm:$0xff] }
  0x50   :  { %v615_v19 = vpop.eup %614  ;;  %476 = vst [vmem:[#allocation8 + $0x20] sm:$0xff] %v444_v4  ;;  %v446_v21 = vadd.f32 %v414_v5, %v350_v56  ;;  %v416_v22 = vmul.f32 %v384_v7, %v320_v1  ;;  %v354_v23 = vmul.f32 %v613_v10, %v290_v2  ;;  %v386_v24 = vsub.f32 1.0, %v613_v10  ;;  %v80_v4 = vld [vmem:[#allocation7 + $0xc0] sm:$0xff]  ;;  %v81_v7 = vld [vmem:[#allocation7 + $0xc8] sm:$0xff]  ;;  %v82_v10 = vld [vmem:[#allocation7 + $0xd0] sm:$0xff] }
  0x51   :  { %v617_v28 = vpop.eup %616  ;;  %477 = vst [vmem:[#allocation8 + $0x28] sm:$0xff] %v445_v11  ;;  %v447_v29 = vadd.f32 %v415_v12, %v351_v63  ;;  %v417_v30 = vmul.f32 %v385_v16, %v321_v8  ;;  %v355_v31 = vmul.f32 %v615_v19, %v291_v9  ;;  %v387_v32 = vsub.f32 1.0, %v615_v19  ;;  %v83_v11 = vld [vmem:[#allocation7 + $0xd8] sm:$0xff]  ;;  %v84_v12 = vld [vmem:[#allocation7 + $0xe0] sm:$0xff]  ;;  %v85_v16 = vld [vmem:[#allocation7 + $0xe8] sm:$0xff] }
  0x52   :  { %v619_v35 = vpop.eup %618  ;;  %478 = vst [vmem:[#allocation8 + $0x30] sm:$0xff] %v446_v21  ;;  %v448_v36 = vadd.f32 %v416_v22, %v352_v6  ;;  %v418_v37 = vmul.f32 %v386_v24, %v322_v17  ;;  %v356_v38 = vmul.f32 %v617_v28, %v292_v18  ;;  %v388_v39 = vsub.f32 1.0, %v617_v28  ;;  %v86_v18 = vld [vmem:[#allocation7 + $0xf0] sm:$0xff]  ;;  %v87_v21 = vld [vmem:[#allocation7 + $0xf8] sm:$0xff] }
  0x53   :  { %v621_v42 = vpop.eup %620  ;;  %479 = vst [vmem:[#allocation8 + $0x38] sm:$0xff] %v447_v29  ;;  %v449_v43 = vadd.f32 %v417_v30, %v353_v15  ;;  %v419_v44 = vmul.f32 %v387_v32, %v323_v25  ;;  %v357_v45 = vmul.f32 %v619_v35, %v293_v27  ;;  %v389_v46 = vsub.f32 1.0, %v619_v35  ;;  %v297_v27 = vld [vmem:[#allocation2 + $0x88] sm:$0xff]  ;;  %v328_v30 = vld [vmem:[#allocation5 + $0x80] sm:$0xff] }
  0x54   :  { %v623_v48 = vpop.eup %622  ;;  %480 = vst [vmem:[#allocation8 + $0x40] sm:$0xff] %v448_v36  ;;  %v450_v49 = vadd.f32 %v418_v37, %v354_v23  ;;  %v420_v50 = vmul.f32 %v388_v39, %v324_v33  ;;  %v358_v51 = vmul.f32 %v621_v42, %v294_v34  ;;  %v390_v52 = vsub.f32 1.0, %v621_v42  ;;  %v329_v35 = vld [vmem:[#allocation5 + $0x88] sm:$0xff] }
  0x55   :  { %v625_v54 = vpop.eup %624  ;;  %481 = vst [vmem:[#allocation8 + $0x48] sm:$0xff] %v449_v43  ;;  %v451_v55 = vadd.f32 %v419_v44, %v355_v31  ;;  %v421_v56 = vmul.f32 %v389_v46, %v325_v40  ;;  %v359_v57 = vmul.f32 %v623_v48, %v295_v41  ;;  %v391_v58 = vsub.f32 1.0, %v623_v48 }
  0x56   :  { %v627_v60 = vpop.eup %626  ;;  %482 = vst [vmem:[#allocation8 + $0x50] sm:$0xff] %v450_v49  ;;  %v452_v61 = vadd.f32 %v420_v50, %v356_v38  ;;  %v422_v62 = vmul.f32 %v390_v52, %v326_v47  ;;  %v200_v63 = vadd.f32 1.0, %v625_v54  ;;  %628 = vpow2.f32 %v818_v13 }
  0x57   :  { %483 = vst [vmem:[#allocation8 + $0x58] sm:$0xff] %v451_v55  ;;  %v453_v1 = vadd.f32 %v421_v56, %v357_v45  ;;  %v423_v2 = vmul.f32 %v391_v58, %v327_v53  ;;  %v201_v3 = vadd.f32 1.0, %v627_v60  ;;  %630 = vpow2.f32 %v820_v14 }
  0x58   :  { %484 = vst [vmem:[#allocation8 + $0x60] sm:$0xff] %v452_v61  ;;  %v454_v5 = vadd.f32 %v422_v62, %v358_v51  ;;  %632 = vrcp.f32 %v200_v63  ;;  %v544_v6 = vmul.f32 -1.442695, %v78_v59  ;;  %v545_v9 = vmul.f32 -1.442695, %v79_v0  ;;  %v298_v62 = vld [vmem:[#allocation2 + $0x90] sm:$0xff] }
  0x59   :  { %485 = vst [vmem:[#allocation8 + $0x68] sm:$0xff] %v453_v1  ;;  %v455_v8 = vadd.f32 %v423_v2, %v359_v57  ;;  %634 = vrcp.f32 %v201_v3  ;;  %v546_v13 = vmul.f32 -1.442695, %v80_v4  ;;  %v547_v14 = vmul.f32 -1.442695, %v81_v7  ;;  %v299_v1 = vld [vmem:[#allocation2 + $0x98] sm:$0xff] }
  0x5a   :  { %486 = vst [vmem:[#allocation8 + $0x70] sm:$0xff] %v454_v5  ;;  %636 = vpow2.f32 %v822_v20  ;;  %v548_v15 = vmul.f32 -1.442695, %v82_v10  ;;  %v549_v17 = vmul.f32 -1.442695, %v83_v11  ;;  %v330_v4 = vld [vmem:[#allocation5 + $0x90] sm:$0xff] }
  0x5b   :  { %487 = vst [vmem:[#allocation8 + $0x78] sm:$0xff] %v455_v8  ;;  %638 = vpow2.f32 %v824_v26  ;;  %v550_v19 = vmul.f32 -1.442695, %v84_v12  ;;  %v551_v22 = vmul.f32 -1.442695, %v85_v16  ;;  %v296_v26 = vld [vmem:[#allocation2 + $0x80] sm:$0xff] }
  0x5c   :  { %640 = vpow2.f32 %v544_v6  ;;  %v552_v20 = vmul.f32 -1.442695, %v86_v18  ;;  %v553_v23 = vmul.f32 -1.442695, %v87_v21  ;;  %v300_v11 = vld [vmem:[#allocation2 + $0xa0] sm:$0xff]  ;;  %v301_v12 = vld [vmem:[#allocation2 + $0xa8] sm:$0xff] }
  0x5d   :  { %642 = vpow2.f32 %v545_v9  ;;  %v331_v9 = vld [vmem:[#allocation5 + $0x98] sm:$0xff]  ;;  %v302_v18 = vld [vmem:[#allocation2 + $0xb0] sm:$0xff] }
  0x5e   :  { %644 = vpow2.f32 %v546_v13 }
  0x5f   :  { %646 = vpow2.f32 %v547_v14 }
  0x60   :  { %648 = vpow2.f32 %v548_v15 }
  0x61   :  { %650 = vpow2.f32 %v549_v17  ;;  %v332_v17 = vld [vmem:[#allocation5 + $0xa0] sm:$0xff] }
  0x62   :  { %652 = vpow2.f32 %v550_v19 }
  0x63   :  { %v629_v24 = vpop.eup %628  ;;  %654 = vpow2.f32 %v551_v22 }
  0x64   :  { %v631_v25 = vpop.eup %630  ;;  %v202_v28 = vadd.f32 1.0, %v629_v24  ;;  %656 = vpow2.f32 %v552_v20  ;;  %v303_v24 = vld [vmem:[#allocation2 + $0xb8] sm:$0xff] }
  0x65   :  { %v633_v29 = vpop.eup %632  ;;  %v203_v31 = vadd.f32 1.0, %v631_v25  ;;  %658 = vpow2.f32 %v553_v23  ;;  %v333_v23 = vld [vmem:[#allocation5 + $0xa8] sm:$0xff] }
  0x66   :  { %v635_v32 = vpop.eup %634  ;;  %v360_v33 = vmul.f32 %v633_v29, %v296_v26  ;;  %v392_v34 = vsub.f32 1.0, %v633_v29  ;;  %660 = vrcp.f32 %v202_v28  ;;  %v334_v29 = vld [vmem:[#allocation5 + $0xb0] sm:$0xff] }
  0x67   :  { %v637_v36 = vpop.eup %636  ;;  %v361_v37 = vmul.f32 %v635_v32, %v297_v27  ;;  %v393_v38 = vsub.f32 1.0, %v635_v32  ;;  %662 = vrcp.f32 %v203_v31 }
  0x68   :  { %v639_v39 = vpop.eup %638  ;;  %v424_v40 = vmul.f32 %v392_v34, %v328_v30  ;;  %v204_v41 = vadd.f32 1.0, %v637_v36  ;;  %v304_v30 = vld [vmem:[#allocation2 + $0xc0] sm:$0xff]  ;;  %v305_v36 = vld [vmem:[#allocation2 + $0xc8] sm:$0xff] }
  0x69   :  { %v641_v42 = vpop.eup %640  ;;  %v425_v43 = vmul.f32 %v393_v38, %v329_v35  ;;  %v205_v44 = vadd.f32 1.0, %v639_v39  ;;  %v335_v35 = vld [vmem:[#allocation5 + $0xb8] sm:$0xff] }
  0x6a   :  { %v643_v45 = vpop.eup %642  ;;  %v456_v46 = vadd.f32 %v424_v40, %v360_v33  ;;  %664 = vrcp.f32 %v204_v41  ;;  %v206_v47 = vadd.f32 1.0, %v641_v42  ;;  %v336_v41 = vld [vmem:[#allocation5 + $0xc0] sm:$0xff]  ;;  %v306_v42 = vld [vmem:[#allocation2 + $0xd0] sm:$0xff] }
  0x6b   :  { %v645_v48 = vpop.eup %644  ;;  %v457_v49 = vadd.f32 %v425_v43, %v361_v37  ;;  %666 = vrcp.f32 %v205_v44  ;;  %v207_v50 = vadd.f32 1.0, %v643_v45 }
  0x6c   :  { %v647_v51 = vpop.eup %646  ;;  %488 = vst [vmem:[#allocation8 + $0x80] sm:$0xff] %v456_v46  ;;  %668 = vrcp.f32 %v206_v47  ;;  %v208_v52 = vadd.f32 1.0, %v645_v48  ;;  %v337_v48 = vld [vmem:[#allocation5 + $0xc8] sm:$0xff] }
  0x6d   :  { %v649_v53 = vpop.eup %648  ;;  %489 = vst [vmem:[#allocation8 + $0x88] sm:$0xff] %v457_v49  ;;  %670 = vrcp.f32 %v207_v50  ;;  %v209_v54 = vadd.f32 1.0, %v647_v51  ;;  %v307_v49 = vld [vmem:[#allocation2 + $0xd8] sm:$0xff] }
  0x6e   :  { %v651_v55 = vpop.eup %650  ;;  %672 = vrcp.f32 %v208_v52  ;;  %v210_v56 = vadd.f32 1.0, %v649_v53 }
  0x6f   :  { %v653_v57 = vpop.eup %652  ;;  %674 = vrcp.f32 %v209_v54  ;;  %v211_v58 = vadd.f32 1.0, %v651_v55  ;;  %v338_v55 = vld [vmem:[#allocation5 + $0xd0] sm:$0xff] }
  0x70   :  { %v655_v59 = vpop.eup %654  ;;  %676 = vrcp.f32 %v210_v56  ;;  %v212_v60 = vadd.f32 1.0, %v653_v57  ;;  %v308_v56 = vld [vmem:[#allocation2 + $0xe0] sm:$0xff] }
  0x71   :  { %v657_v61 = vpop.eup %656  ;;  %678 = vrcp.f32 %v211_v58  ;;  %v213_v63 = vadd.f32 1.0, %v655_v59 }
  0x72   :  { %v659_v0 = vpop.eup %658  ;;  %680 = vrcp.f32 %v212_v60  ;;  %v214_v2 = vadd.f32 1.0, %v657_v61 }
  0x73   :  { %v661_v3 = vpop.eup %660  ;;  %682 = vrcp.f32 %v213_v63  ;;  %v215_v5 = vadd.f32 1.0, %v659_v0  ;;  %v309_v63 = vld [vmem:[#allocation2 + $0xe8] sm:$0xff] }
  0x74   :  { %v663_v6 = vpop.eup %662  ;;  %v362_v7 = vmul.f32 %v661_v3, %v298_v62  ;;  %v394_v8 = vsub.f32 1.0, %v661_v3  ;;  %684 = vrcp.f32 %v214_v2  ;;  %v339_v62 = vld [vmem:[#allocation5 + $0xd8] sm:$0xff] }
  0x75   :  { %v363_v10 = vmul.f32 %v663_v6, %v299_v1  ;;  %v395_v13 = vsub.f32 1.0, %v663_v6  ;;  %686 = vrcp.f32 %v215_v5  ;;  %v340_v5 = vld [vmem:[#allocation5 + $0xe0] sm:$0xff]  ;;  %v310_v6 = vld [vmem:[#allocation2 + $0xf0] sm:$0xff] }
  0x76   :  { %v426_v14 = vmul.f32 %v394_v8, %v330_v4 }
  0x77   :  { %v665_v15 = vpop.eup %664  ;;  %v427_v16 = vmul.f32 %v395_v13, %v331_v9 }
  0x78   :  { %v667_v19 = vpop.eup %666  ;;  %v458_v21 = vadd.f32 %v426_v14, %v362_v7  ;;  %v364_v22 = vmul.f32 %v665_v15, %v300_v11  ;;  %v396_v20 = vsub.f32 1.0, %v665_v15  ;;  %v341_v11 = vld [vmem:[#allocation5 + $0xe8] sm:$0xff]  ;;  %v311_v14 = vld [vmem:[#allocation2 + $0xf8] sm:$0xff] }
  0x79   :  { %v669_v26 = vpop.eup %668  ;;  %v459_v25 = vadd.f32 %v427_v16, %v363_v10  ;;  %v365_v27 = vmul.f32 %v667_v19, %v301_v12  ;;  %v397_v28 = vsub.f32 1.0, %v667_v19  ;;  %v342_v19 = vld [vmem:[#allocation5 + $0xf0] sm:$0xff] }
  0x7a   :  { %v671_v31 = vpop.eup %670  ;;  %490 = vst [vmem:[#allocation8 + $0x90] sm:$0xff] %v458_v21  ;;  %v428_v32 = vmul.f32 %v396_v20, %v332_v17  ;;  %v366_v33 = vmul.f32 %v669_v26, %v302_v18  ;;  %v398_v34 = vsub.f32 1.0, %v669_v26  ;;  %v343_v26 = vld [vmem:[#allocation5 + $0xf8] sm:$0xff] }
  0x7b   :  { %v673_v37 = vpop.eup %672  ;;  %491 = vst [vmem:[#allocation8 + $0x98] sm:$0xff] %v459_v25  ;;  %v429_v38 = vmul.f32 %v397_v28, %v333_v23  ;;  %v367_v39 = vmul.f32 %v671_v31, %v303_v24  ;;  %v399_v40 = vsub.f32 1.0, %v671_v31 }
  0x7c   :  { %v675_v43 = vpop.eup %674  ;;  %v460_v44 = vadd.f32 %v428_v32, %v364_v22  ;;  %v430_v45 = vmul.f32 %v398_v34, %v334_v29  ;;  %v368_v46 = vmul.f32 %v673_v37, %v304_v30  ;;  %v400_v47 = vsub.f32 1.0, %v673_v37 }
  0x7d   :  { %v677_v50 = vpop.eup %676  ;;  %v461_v51 = vadd.f32 %v429_v38, %v365_v27  ;;  %v431_v52 = vmul.f32 %v399_v40, %v335_v35  ;;  %v369_v53 = vmul.f32 %v675_v43, %v305_v36  ;;  %v401_v54 = vsub.f32 1.0, %v675_v43 }
  0x7e   :  { %v679_v57 = vpop.eup %678  ;;  %492 = vst [vmem:[#allocation8 + $0xa0] sm:$0xff] %v460_v44  ;;  %v462_v58 = vadd.f32 %v430_v45, %v366_v33  ;;  %v432_v59 = vmul.f32 %v400_v47, %v336_v41  ;;  %v370_v60 = vmul.f32 %v677_v50, %v306_v42  ;;  %v402_v61 = vsub.f32 1.0, %v677_v50 }
  0x7f   :  { %v681_v0 = vpop.eup %680  ;;  %493 = vst [vmem:[#allocation8 + $0xa8] sm:$0xff] %v461_v51  ;;  %v463_v1 = vadd.f32 %v431_v52, %v367_v39  ;;  %v433_v2 = vmul.f32 %v401_v54, %v337_v48  ;;  %v371_v3 = vmul.f32 %v679_v57, %v307_v49  ;;  %v403_v4 = vsub.f32 1.0, %v679_v57 }
  0x80   :  { %v683_v7 = vpop.eup %682  ;;  %494 = vst [vmem:[#allocation8 + $0xb0] sm:$0xff] %v462_v58  ;;  %v464_v8 = vadd.f32 %v432_v59, %v368_v46  ;;  %v434_v9 = vmul.f32 %v402_v61, %v338_v55  ;;  %v372_v10 = vmul.f32 %v681_v0, %v308_v56  ;;  %v404_v13 = vsub.f32 1.0, %v681_v0 }
  0x81   :  { %v685_v12 = vpop.eup %684  ;;  %495 = vst [vmem:[#allocation8 + $0xb8] sm:$0xff] %v463_v1  ;;  %v465_v15 = vadd.f32 %v433_v2, %v369_v53  ;;  %v435_v16 = vmul.f32 %v403_v4, %v339_v62  ;;  %v373_v17 = vmul.f32 %v683_v7, %v309_v63  ;;  %v405_v18 = vsub.f32 1.0, %v683_v7 }
  0x82   :  { %v687_v21 = vpop.eup %686  ;;  %496 = vst [vmem:[#allocation8 + $0xc0] sm:$0xff] %v464_v8  ;;  %v466_v22 = vadd.f32 %v434_v9, %v370_v60  ;;  %v436_v20 = vmul.f32 %v404_v13, %v340_v5  ;;  %v374_v23 = vmul.f32 %v685_v12, %v310_v6  ;;  %v406_v24 = vsub.f32 1.0, %v685_v12 }
  0x83   :  { %497 = vst [vmem:[#allocation8 + $0xc8] sm:$0xff] %v465_v15  ;;  %v467_v25 = vadd.f32 %v435_v16, %v371_v3  ;;  %v437_v27 = vmul.f32 %v405_v18, %v341_v11  ;;  %v375_v28 = vmul.f32 %v687_v21, %v311_v14  ;;  %v407_v29 = vsub.f32 1.0, %v687_v21 }
  0x84   :  { %498 = vst [vmem:[#allocation8 + $0xd0] sm:$0xff] %v466_v22  ;;  %v468_v30 = vadd.f32 %v436_v20, %v372_v10  ;;  %v438_v31 = vmul.f32 %v406_v24, %v342_v19 }
  0x85   :  { %499 = vst [vmem:[#allocation8 + $0xd8] sm:$0xff] %v467_v25  ;;  %v469_v32 = vadd.f32 %v437_v27, %v373_v17  ;;  %v439_v33 = vmul.f32 %v407_v29, %v343_v26 }
  0x86   :  { %500 = vst [vmem:[#allocation8 + $0xe0] sm:$0xff] %v468_v30  ;;  %v470_v34 = vadd.f32 %v438_v31, %v374_v23 }
  0x87   :  { %501 = vst [vmem:[#allocation8 + $0xe8] sm:$0xff] %v469_v32  ;;  %v471_v35 = vadd.f32 %v439_v33, %v375_v28 }
  0x88   :  { %502 = vst [vmem:[#allocation8 + $0xf0] sm:$0xff] %v470_v34 }
  0x89   :  { %503 = vst [vmem:[#allocation8 + $0xf8] sm:$0xff] %v471_v35 }
  0x8a   :  { %759 = shalt.err (!%p756_p5)
}
  0x8b   :  { %515 = dma.vmem_to_hbm [thread:$0]  %s510_s2, 4096, %s839_s3, [#allocation4], %s776_s17, %s776_s17, %s777_s18  }
  0x8c   :  { %772 = dma.done.wait [#allocation4], 4096  }
  0x8d   :  { %773 = vsyncadd [#allocation4], 4294963200 }
  0x8e   :  { %519 = vsyncpa [#allocation3], 1 }
  0x8f   :  { %520 = vsyncpa [#allocation6], 1 }
  0x90   :  { %521 = vsyncpa [#allocation4], 1 }

</bundles_post_ra>
